<compile_context>
chip_gen: v7x
topology: tpu7x:2x2x1
jax: 0.10.0
libtpu: 0.0.40
codegen_flags: <defaults>
</compile_context>

<pallas_src>
import functools

import jax
import jax.numpy as jnp
from jax.experimental import pallas as pl
from jax.experimental.pallas import tpu as pltpu

_SUPPORTED = ("relu", "relu6", "hard_sigmoid", "hard_swish",
              "leakyrelu", "gelu", "swish")
_PIECEWISE_LINEAR = ("relu", "relu6", "hard_sigmoid", "hard_swish", "leakyrelu")

_LANE_CANDIDATES = (32768, 16384, 8192, 4096, 2048, 1024, 512, 256, 128)
_MIN_SPLIT_BYTES = 512 * 1024   # above this, force >= _MIN_GRID_STEPS steps
_MIN_GRID_STEPS = 4             # both v7x TCs get work + in/compute/out overlap


def _device_kind():
    try:
        return jax.devices()[0].device_kind.lower()
    except Exception:
        return ""


_KIND = _device_kind()
# v6e / v7x: bf16-native VPU/EUP and faster HBM -> bigger blocks, native-dtype
# compute for piecewise-linear activations.  v5e / older / unknown: conservative.
_IS_V6_OR_NEWER = any(t in _KIND for t in ("v6", "v7", "tpu7", "7x"))
_BF16_NATIVE_VPU = _IS_V6_OR_NEWER
# 4 MiB blocks -> double-buffered in+out ~16 MiB: inside the 32 MiB scoped-VMEM
# default on v6e/v7x.  2 MiB keeps v5e (16 MiB default scoped VMEM) safe.
_TARGET_BLOCK_BYTES = (4 << 20) if _IS_V6_OR_NEWER else (2 << 20)


# ----------------------------- shared elementwise math ------------------------
def _apply_act(x, act_type):
    """Elementwise activation math (kernel body and pure-JAX reference)."""
    if act_type == "relu":
        return jnp.maximum(x, 0.0)
    if act_type == "relu6":
        return jnp.clip(x, 0.0, 6.0)
    if act_type == "hard_sigmoid":
        # Module's Hsigmoid: F.relu6(1.2*x + 3.0) / 6.0  (note the 1.2 slope).
        return jnp.clip(1.2 * x + 3.0, 0.0, 6.0) * (1.0 / 6.0)
    if act_type == "hard_swish":
        # x * F.relu6(x + 3.0) / 6.0
        return x * jnp.clip(x + 3.0, 0.0, 6.0) * (1.0 / 6.0)
    if act_type == "leakyrelu":
        # nn.LeakyReLU default negative_slope = 0.01
        return jnp.where(x >= 0, x, 0.01 * x)
    if act_type == "gelu":
        # torch.nn.functional.gelu default: exact (erf-based) GELU.
        return 0.5 * x * (1.0 + jax.lax.erf(x * 0.7071067811865476))
    if act_type == "swish":
        return x * jax.nn.sigmoid(x)
    raise NotImplementedError(act_type)


def _make_kernel(act_type):
    def kernel(x_ref, o_ref):
        x = x_ref[...]
        if jnp.issubdtype(x.dtype, jnp.floating) and x.dtype != jnp.float32:
            # Narrow float inputs: compute natively on bf16-capable VPUs
            # (v6e/v7x) for the piecewise-linear acts (halves VALU ops and
            # vreg pressure); otherwise upcast to f32 (v5e has no bf16
            # VPU/EUP; gelu/swish keep f32 internal for erf/sigmoid).
            if not (_BF16_NATIVE_VPU and act_type in _PIECEWISE_LINEAR):
                x = x.astype(jnp.float32)
        o_ref[...] = _apply_act(x, act_type).astype(o_ref.dtype)
    return kernel


# ----------------------------- Pallas launcher ---------------------------------
def _pallas_2d(x2d, act_type):
    rows, lanes = x2d.shape
    itemsize = jnp.dtype(x2d.dtype).itemsize
    sublanes = max(8, 32 // itemsize)  # 8 (f32) / 16 (bf16) / 32 (int8)
    total_bytes = rows * lanes * itemsize

    block_rows = max(1, _TARGET_BLOCK_BYTES // (lanes * itemsize))
    if total_bytes > _MIN_SPLIT_BYTES:
        # Never collapse a medium/large slab into a single grid step: keep at
        # least _MIN_GRID_STEPS steps for megacore sharding + DMA overlap.
        block_rows = min(block_rows, max(1, rows // _MIN_GRID_STEPS))
    if block_rows >= rows:
        block_rows = rows                        # whole slab in one block
    elif block_rows >= sublanes:
        block_rows = (block_rows // sublanes) * sublanes
    else:
        block_rows = min(rows, sublanes)

    n = rows * lanes
    is_transcendental = act_type in ("gelu", "swish")
    cost = pl.CostEstimate(
        flops=(8 if is_transcendental else 3) * n,
        transcendentals=(n if is_transcendental else 0),
        bytes_accessed=2 * n * itemsize,
    )

    grid = (pl.cdiv(rows, block_rows),)          # partial tail block is masked
    return pl.pallas_call(
        _make_kernel(act_type),
        out_shape=jax.ShapeDtypeStruct((rows, lanes), x2d.dtype),
        grid=grid,
        in_specs=[pl.BlockSpec((block_rows, lanes), lambda i: (i, 0))],
        out_specs=pl.BlockSpec((block_rows, lanes), lambda i: (i, 0)),
        compiler_params=pltpu.CompilerParams(
            dimension_semantics=("parallel",)),
        cost_estimate=cost,
    )(x2d)


@functools.partial(jax.jit, static_argnames=("act_type",))
def activation(x, act_type: str):
    """Pallas equivalent of Activation(act_type)(x) for NCHW (or any shape)."""
    act_type = act_type.lower()
    if act_type == "sigmoid":
        raise NotImplementedError  # matches the PyTorch module
    if act_type not in _SUPPORTED:
        raise NotImplementedError(act_type)

    orig_shape = x.shape
    flat = x.reshape(-1)
    n = flat.shape[0]
    itemsize = jnp.dtype(x.dtype).itemsize
    sublanes = max(8, 32 // itemsize)

    # Pad once (rare path) so the slab is a multiple of 128; sliced off below.
    pad_n = ((n + 127) // 128) * 128
    if pad_n != n:
        flat = jnp.pad(flat, (0, pad_n - n))

    # Widest lane width (multiple of 128) dividing pad_n; prefer one that also
    # leaves enough rows to split the grid into several blocks.
    divisors = [c for c in _LANE_CANDIDATES if pad_n % c == 0]
    lanes = next((c for c in divisors if pad_n // c >= _MIN_GRID_STEPS * sublanes),
                 divisors[0])

    out = _pallas_2d(flat.reshape(pad_n // lanes, lanes), act_type).reshape(-1)
    if pad_n != n:
        out = out[:n]
    return out.reshape(orig_shape)


# ----------------------------- pure-JAX reference ------------------------------
def _reference(x, act_type):
    act_type = act_type.lower()
    if act_type == "gelu":
        return jax.nn.gelu(x, approximate=False)
    return _apply_act(x, act_type)


if __name__ == "__main__":
    key = jax.random.PRNGKey(0)
    k1, k2, k3, k4 = jax.random.split(key, 4)

    # Main case: NCHW f32 (divisible by 128 -> wide lane-dense path).
    x1 = jax.random.normal(k1, (2, 4, 16, 16), dtype=jnp.float32) * 3.0
    # Ragged case: element count not a multiple of 128 (pad + slice path).
    x2 = jax.random.normal(k2, (2, 3, 11, 13), dtype=jnp.float32) * 3.0
    # Medium case: > 512 KiB so the grid splits into multiple blocks.
    x4 = jax.random.normal(k4, (1, 32, 128, 128), dtype=jnp.float32) * 3.0
    # bf16 case: native bf16 compute on v6e/v7x, f32 on v5e; bf16 store.
    x3 = (jax.random.normal(k3, (2, 4, 16, 16), dtype=jnp.float32) * 3.0
          ).astype(jnp.bfloat16)

    for act_type in _SUPPORTED:
        for x in (x1, x2, x4):
            out = jax.block_until_ready(activation(x, act_type))
            ref = _reference(x, act_type)
            assert out.shape == x.shape and out.dtype == x.dtype
            if not jnp.allclose(out, ref, atol=1e-5, rtol=1e-5):
                raise AssertionError(f"mismatch: {act_type} shape={x.shape}")

        out = jax.block_until_ready(activation(x3, act_type))
        ref = _reference(x3.astype(jnp.float32), act_type)
        assert out.shape == x3.shape and out.dtype == x3.dtype
        if not jnp.allclose(out.astype(jnp.float32), ref, atol=0.1, rtol=0.05):
            raise AssertionError(f"bf16 mismatch: {act_type}")

    print("KERNEL_OK")
</pallas_src>

<mosaic_0001>
module attributes {stable_mosaic.version = 11 : i64} {
  func.func @kernel(%arg0: i32, %arg1: memref<1x2048xf32, #tpu.memory_space<vmem>>, %arg2: memref<1x2048xf32, #tpu.memory_space<vmem>>) attributes {dimension_semantics = [#tpu.dimension_semantics<parallel>], iteration_bounds = array<i64: 1>, scalar_prefetch = 0 : i64, scratch_operands = 0 : i64, tpu.core_type = #tpu.core_type<tc>, window_params = [{transform_indices = @transform_0, window_bounds = array<i64: 1, 2048>}, {transform_indices = @transform_1, window_bounds = array<i64: 1, 2048>}]} {
    %c0 = arith.constant 0 : index
    %c0_0 = arith.constant 0 : index
    %0 = vector.load %arg1[%c0, %c0_0] : memref<1x2048xf32, #tpu.memory_space<vmem>>, vector<1x2048xf32>
    %cst = arith.constant 0.000000e+00 : f32
    %1 = vector.broadcast %cst : f32 to vector<1x2048xf32>
    %2 = arith.maximumf %0, %1 : vector<1x2048xf32>
    %c0_1 = arith.constant 0 : index
    %c0_2 = arith.constant 0 : index
    %3 = vector.load %arg2[%c0_1, %c0_2] : memref<1x2048xf32, #tpu.memory_space<vmem>>, vector<1x2048xf32>
    tpu.vector_store %arg2[%c0_1, %c0_2], %2 {strides = array<i32>} : memref<1x2048xf32, #tpu.memory_space<vmem>>, vector<1x2048xf32>,
    return
  }
  func.func @transform_0(%arg0: i32) -> (i32, i32) {
    %c0_i32 = arith.constant 0 : i32
    %c0_i32_0 = arith.constant 0 : i32
    return %arg0, %c0_i32 : i32, i32
  }
  func.func @transform_1(%arg0: i32) -> (i32, i32) {
    %c0_i32 = arith.constant 0 : i32
    %c0_i32_0 = arith.constant 0 : i32
    return %arg0, %c0_i32 : i32, i32
  }
}

</mosaic_0001>

<bundles_post_ra>
// kernel: activation.1
= control target key start
LH: loop header
LB: loop body
LE: loop exit
PB: predicated region body
PF: predicated region fallthrough
CT: control target
= control target key end

     0   :  { %s40_s0 = inlined_call_operand.vmem [shape: f32[1,2048], index: 0, kind: input, shape index: {}]   ;;  %s41_s1 = inlined_call_operand.vmem [shape: f32[1,2048], index: 1, kind: output, shape index: {}]  }
   0x1   :  { %v8_v0 = vld [vmem:[%s40_s0] sm:$0xff]  ;;  %v9_v1 = vld [vmem:[%s40_s0 + $0x8] sm:$0xff] }
   0x2   :  { %v10_v2 = vmax.f32 %v8_v0, 0.0  ;;  %v11_v3 = vmax.f32 %v9_v1, 0.0 }
   0x4   :  { %12 = vst [vmem:[%s41_s1] sm:$0xff] %v10_v2  ;;  %13 = vst [vmem:[%s41_s1 + $0x8] sm:$0xff] %v11_v3 }

</bundles_post_ra>
